<compile_context>
chip_gen: v6e
topology: v6e:2x2x1
jax: 0.10.0
libtpu: 0.0.40
codegen_flags: <defaults>
</compile_context>

<pallas_src>
import math
from functools import partial

import jax
import jax.numpy as jnp
from jax.experimental import pallas as pl
from jax.experimental.pallas import tpu as pltpu


def _round_up(x, m):
    return (x + m - 1) // m * m


def _cdiv(a, b):
    return -(-a // b)


def _mlp_fused_kernel(*refs, num_layers, sigmoid_output):
    # refs = (x_ref, w1, b1, w2, b2, ..., wL, bL, o_ref)
    x_ref = refs[0]
    o_ref = refs[-1]
    h = x_ref[...]                                    # (TM, in_dim) f32
    for i in range(num_layers):
        w = refs[1 + 2 * i][...]                      # (n_in_i, n_out_i) resident in VMEM
        b = refs[2 + 2 * i][...]                      # (1, n_out_i)
        h = jnp.dot(h, w,
                    preferred_element_type=jnp.float32,
                    precision=jax.lax.Precision.HIGHEST) + b
        if i < num_layers - 1:
            h = jnp.maximum(h, 0.0)                   # ReLU between layers
    if sigmoid_output:
        h = jax.nn.sigmoid(h)
    o_ref[...] = h.astype(o_ref.dtype)


def mlp_my_forward(x, params, sigmoid_output=False, tm=1024):
    """x: (..., input_dim); params: list of (w_t (n_in, n_out), b (n_out,)).

    Runs the whole MLP as a single fused Pallas kernel tiled over the flattened
    token dimension M = prod(leading dims). No feature-dim or M padding."""
    num_layers = len(params)
    lead_shape = x.shape[:-1]
    in_dim = x.shape[-1]
    out_dim = params[-1][1].shape[0]

    x2d = x.reshape(-1, in_dim).astype(jnp.float32)
    M = x2d.shape[0]

    # --- M tile choice -------------------------------------------------------
    # Large tiles amortize per-grid-step overhead (mem-bound sweet spot 512-1024),
    # but keep >= 8 tiles so the v7x megacore split + double buffering have work.
    tm_eff = min(tm, max(8, _round_up(_cdiv(M, 8), 8)))
    if tm_eff >= M:
        tm_eff = M                      # full-extent block (valid even if M % 8 != 0)
    grid = (_cdiv(M, tm_eff),)          # partial last tile handled by Pallas masking

    # --- params (f32, bias as (1, N) row) ------------------------------------
    params32 = [(w.astype(jnp.float32), b.astype(jnp.float32).reshape(1, -1))
                for w, b in params]

    # --- specs (full-extent last dims: no lane padding) -----------------------
    in_specs = [pl.BlockSpec((tm_eff, in_dim), lambda i: (i, 0))]
    flat_inputs = [x2d]
    for w, b in params32:
        ki, ko = w.shape
        in_specs.append(pl.BlockSpec((ki, ko), lambda i: (0, 0)))   # resident weight
        in_specs.append(pl.BlockSpec((1, ko), lambda i: (0, 0)))    # resident bias
        flat_inputs += [w, b]
    out_spec = pl.BlockSpec((tm_eff, out_dim), lambda i: (i, 0))

    # --- compiler hints (true, unpadded sizes) --------------------------------
    flops = int(sum(2 * M * w.shape[0] * w.shape[1] for w, _ in params32))
    param_elems = int(sum(w.size + b.size for w, b in params32))
    bytes_accessed = int(4 * (M * in_dim + M * out_dim + param_elems))
    transcendentals = int(M * out_dim) if sigmoid_output else 0

    hidden_max = max(w.shape[1] for w, _ in params32)
    vmem_bytes = 4 * (2 * tm_eff * (in_dim + out_dim)   # double-buffered x / out tiles
                      + 2 * param_elems                  # resident (double-buffered) params
                      + 2 * tm_eff * hidden_max)         # live intermediates
    # Cap well below physical VMEM (v7x TC has only 64 MiB) — actual need is a few MiB.
    vmem_limit = int(min(max(4 * vmem_bytes, 16 << 20), 40 << 20))

    kernel = partial(_mlp_fused_kernel,
                     num_layers=num_layers, sigmoid_output=sigmoid_output)

    out2d = pl.pallas_call(
        kernel,
        out_shape=jax.ShapeDtypeStruct((M, out_dim), jnp.float32),
        grid_spec=pltpu.PrefetchScalarGridSpec(
            num_scalar_prefetch=0,
            grid=grid,
            in_specs=in_specs,
            out_specs=out_spec,
        ),
        compiler_params=pltpu.CompilerParams(
            dimension_semantics=("parallel",),   # megacore sharding on v7x
            vmem_limit_bytes=vmem_limit,
        ),
        cost_estimate=pl.CostEstimate(
            flops=flops,
            transcendentals=transcendentals,
            bytes_accessed=bytes_accessed,
        ),
    )(*flat_inputs)

    return out2d.reshape(*lead_shape, out_dim)


def init_mlp_params(key, input_dim, hidden_dim, output_dim, num_layers):
    """Deterministic init mirroring nn.Linear default (uniform +-1/sqrt(fan_in)).
    Weights stored pre-transposed as (n_in, n_out)."""
    h = [hidden_dim] * (num_layers - 1)
    dims_in = [input_dim] + h
    dims_out = h + [output_dim]
    params = []
    for n_in, n_out in zip(dims_in, dims_out):
        key, kw, kb = jax.random.split(key, 3)
        bound = 1.0 / math.sqrt(n_in)
        w_t = jax.random.uniform(kw, (n_in, n_out), jnp.float32, -bound, bound)
        b = jax.random.uniform(kb, (n_out,), jnp.float32, -bound, bound)
        params.append((w_t, b))
    return params


def mlp_my_reference(x, params, sigmoid_output=False):
    num_layers = len(params)
    h = x.astype(jnp.float32)
    for i, (w_t, b) in enumerate(params):
        h = jnp.dot(h, w_t, precision=jax.lax.Precision.HIGHEST) + b
        if i < num_layers - 1:
            h = jnp.maximum(h, 0.0)
    if sigmoid_output:
        h = jax.nn.sigmoid(h)
    return h


if __name__ == "__main__":
    key = jax.random.PRNGKey(0)
    batch, seq = 2, 8
    input_dim, hidden_dim, output_dim, num_layers = 32, 32, 16, 3

    kx, kp = jax.random.split(key)
    x = jax.random.normal(kx, (batch, seq, input_dim), jnp.float32)
    params = init_mlp_params(kp, input_dim, hidden_dim, output_dim, num_layers)

    for sigmoid_output in (False, True):
        fwd = jax.jit(partial(mlp_my_forward, sigmoid_output=sigmoid_output))
        out = jax.block_until_ready(fwd(x, params))
        ref = mlp_my_reference(x, params, sigmoid_output=sigmoid_output)
        assert out.shape == (batch, seq, output_dim), out.shape
        assert jnp.allclose(out, ref, atol=1e-5, rtol=1e-5), \
            f"mismatch vs reference (sigmoid_output={sigmoid_output})"

    print("KERNEL_OK")
</pallas_src>

<mosaic_0001>
module attributes {stable_mosaic.version = 11 : i64} {
  func.func @_mlp_fused_kernel(%arg0: i32, %arg1: memref<8x32xf32, #tpu.memory_space<vmem>>, %arg2: memref<32x32xf32, #tpu.memory_space<vmem>>, %arg3: memref<1x32xf32, #tpu.memory_space<vmem>>, %arg4: memref<32x32xf32, #tpu.memory_space<vmem>>, %arg5: memref<1x32xf32, #tpu.memory_space<vmem>>, %arg6: memref<32x16xf32, #tpu.memory_space<vmem>>, %arg7: memref<1x16xf32, #tpu.memory_space<vmem>>, %arg8: memref<8x16xf32, #tpu.memory_space<vmem>>) attributes {dimension_semantics = [#tpu.dimension_semantics<parallel>], iteration_bounds = array<i64: 2>, scalar_prefetch = 0 : i64, scratch_operands = 0 : i64, tpu.core_type = #tpu.core_type<tc>, window_params = [{transform_indices = @transform_0, window_bounds = array<i64: 8, 32>}, {pipeline_mode = #tpu.pipeline_mode<synchronous>, transform_indices = @transform_1, window_bounds = array<i64: 32, 32>}, {pipeline_mode = #tpu.pipeline_mode<synchronous>, transform_indices = @transform_2, window_bounds = array<i64: 1, 32>}, {pipeline_mode = #tpu.pipeline_mode<synchronous>, transform_indices = @transform_3, window_bounds = array<i64: 32, 32>}, {pipeline_mode = #tpu.pipeline_mode<synchronous>, transform_indices = @transform_4, window_bounds = array<i64: 1, 32>}, {pipeline_mode = #tpu.pipeline_mode<synchronous>, transform_indices = @transform_5, window_bounds = array<i64: 32, 16>}, {pipeline_mode = #tpu.pipeline_mode<synchronous>, transform_indices = @transform_6, window_bounds = array<i64: 1, 16>}, {transform_indices = @transform_7, window_bounds = array<i64: 8, 16>}]} {
    %c0 = arith.constant 0 : index
    %c0_0 = arith.constant 0 : index
    %0 = vector.load %arg1[%c0, %c0_0] : memref<8x32xf32, #tpu.memory_space<vmem>>, vector<8x32xf32>
    %c0_1 = arith.constant 0 : index
    %c0_2 = arith.constant 0 : index
    %1 = vector.load %arg2[%c0_1, %c0_2] : memref<32x32xf32, #tpu.memory_space<vmem>>, vector<32x32xf32>
    %c0_3 = arith.constant 0 : index
    %c0_4 = arith.constant 0 : index
    %2 = vector.load %arg3[%c0_3, %c0_4] : memref<1x32xf32, #tpu.memory_space<vmem>>, vector<1x32xf32>
    %cst = arith.constant dense<0.000000e+00> : vector<8x32xf32>
    %3 = tpu.matmul %0, %1, %cst {dimension_numbers = #tpu.dot_dimension_numbers<[1], [0], [0], [1], [0, 0, 1, 1], [], []>, precision = #tpu.contract_precision<fp32>} : vector<8x32xf32>, vector<32x32xf32>, vector<8x32xf32> -> vector<8x32xf32>
    %4 = vector.broadcast %2 : vector<1x32xf32> to vector<8x32xf32>
    %5 = arith.addf %3, %4 : vector<8x32xf32>
    %cst_5 = arith.constant 0.000000e+00 : f32
    %6 = vector.broadcast %cst_5 : f32 to vector<8x32xf32>
    %7 = arith.maximumf %5, %6 : vector<8x32xf32>
    %c0_6 = arith.constant 0 : index
    %c0_7 = arith.constant 0 : index
    %8 = vector.load %arg4[%c0_6, %c0_7] : memref<32x32xf32, #tpu.memory_space<vmem>>, vector<32x32xf32>
    %c0_8 = arith.constant 0 : index
    %c0_9 = arith.constant 0 : index
    %9 = vector.load %arg5[%c0_8, %c0_9] : memref<1x32xf32, #tpu.memory_space<vmem>>, vector<1x32xf32>
    %cst_10 = arith.constant dense<0.000000e+00> : vector<8x32xf32>
    %10 = tpu.matmul %7, %8, %cst_10 {dimension_numbers = #tpu.dot_dimension_numbers<[1], [0], [0], [1], [0, 0, 1, 1], [], []>, precision = #tpu.contract_precision<fp32>} : vector<8x32xf32>, vector<32x32xf32>, vector<8x32xf32> -> vector<8x32xf32>
    %11 = vector.broadcast %9 : vector<1x32xf32> to vector<8x32xf32>
    %12 = arith.addf %10, %11 : vector<8x32xf32>
    %cst_11 = arith.constant 0.000000e+00 : f32
    %13 = vector.broadcast %cst_11 : f32 to vector<8x32xf32>
    %14 = arith.maximumf %12, %13 : vector<8x32xf32>
    %c0_12 = arith.constant 0 : index
    %c0_13 = arith.constant 0 : index
    %15 = vector.load %arg6[%c0_12, %c0_13] : memref<32x16xf32, #tpu.memory_space<vmem>>, vector<32x16xf32>
    %c0_14 = arith.constant 0 : index
    %c0_15 = arith.constant 0 : index
    %16 = vector.load %arg7[%c0_14, %c0_15] : memref<1x16xf32, #tpu.memory_space<vmem>>, vector<1x16xf32>
    %cst_16 = arith.constant dense<0.000000e+00> : vector<8x16xf32>
    %17 = tpu.matmul %14, %15, %cst_16 {dimension_numbers = #tpu.dot_dimension_numbers<[1], [0], [0], [1], [0, 0, 1, 1], [], []>, precision = #tpu.contract_precision<fp32>} : vector<8x32xf32>, vector<32x16xf32>, vector<8x16xf32> -> vector<8x16xf32>
    %18 = vector.broadcast %16 : vector<1x16xf32> to vector<8x16xf32>
    %19 = arith.addf %17, %18 : vector<8x16xf32>
    %c0_17 = arith.constant 0 : index
    %c0_18 = arith.constant 0 : index
    %20 = vector.load %arg8[%c0_17, %c0_18] : memref<8x16xf32, #tpu.memory_space<vmem>>, vector<8x16xf32>
    tpu.vector_store %arg8[%c0_17, %c0_18], %19 {strides = array<i32>} : memref<8x16xf32, #tpu.memory_space<vmem>>, vector<8x16xf32>,
    return
  }
  func.func @transform_0(%arg0: i32) -> (i32, i32) {
    %c0_i32 = arith.constant 0 : i32
    %c0_i32_0 = arith.constant 0 : i32
    return %arg0, %c0_i32 : i32, i32
  }
  func.func @transform_1(%arg0: i32) -> (i32, i32) {
    %c0_i32 = arith.constant 0 : i32
    %c0_i32_0 = arith.constant 0 : i32
    %c0_i32_1 = arith.constant 0 : i32
    return %c0_i32, %c0_i32_0 : i32, i32
  }
  func.func @transform_2(%arg0: i32) -> (i32, i32) {
    %c0_i32 = arith.constant 0 : i32
    %c0_i32_0 = arith.constant 0 : i32
    %c0_i32_1 = arith.constant 0 : i32
    return %c0_i32, %c0_i32_0 : i32, i32
  }
  func.func @transform_3(%arg0: i32) -> (i32, i32) {
    %c0_i32 = arith.constant 0 : i32
    %c0_i32_0 = arith.constant 0 : i32
    %c0_i32_1 = arith.constant 0 : i32
    return %c0_i32, %c0_i32_0 : i32, i32
  }
  func.func @transform_4(%arg0: i32) -> (i32, i32) {
    %c0_i32 = arith.constant 0 : i32
    %c0_i32_0 = arith.constant 0 : i32
    %c0_i32_1 = arith.constant 0 : i32
    return %c0_i32, %c0_i32_0 : i32, i32
  }
  func.func @transform_5(%arg0: i32) -> (i32, i32) {
    %c0_i32 = arith.constant 0 : i32
    %c0_i32_0 = arith.constant 0 : i32
    %c0_i32_1 = arith.constant 0 : i32
    return %c0_i32, %c0_i32_0 : i32, i32
  }
  func.func @transform_6(%arg0: i32) -> (i32, i32) {
    %c0_i32 = arith.constant 0 : i32
    %c0_i32_0 = arith.constant 0 : i32
    %c0_i32_1 = arith.constant 0 : i32
    return %c0_i32, %c0_i32_0 : i32, i32
  }
  func.func @transform_7(%arg0: i32) -> (i32, i32) {
    %c0_i32 = arith.constant 0 : i32
    %c0_i32_0 = arith.constant 0 : i32
    return %arg0, %c0_i32 : i32, i32
  }
}

</mosaic_0001>

<bundles_post_ra>
// kernel: mlp_my_forward.1
= control target key start
LH: loop header
LB: loop body
LE: loop exit
PB: predicated region body
PF: predicated region fallthrough
CT: control target
= control target key end

     0   :  { %12 = vsyncpa [#allocation3], 0  ;;  %s2922_s0 = inlined_call_operand.vmem [shape: f32[16,32], index: 0, kind: input, shape index: {}]   ;;  %s2923_s1 = inlined_call_operand.vmem [shape: f32[32,32], index: 1, kind: input, shape index: {}]   ;;  %s2924_s2 = inlined_call_operand.hbm [shape: f32[1,32], index: 2, kind: input, shape index: {}]   ;;  %s2925_s3 = inlined_call_operand.hbm [shape: f32[32,32], index: 3, kind: input, shape index: {}]   ;;  %s2926_s4 = inlined_call_operand.hbm [shape: f32[1,32], index: 4, kind: input, shape index: {}]   ;;  %s2927_s5 = inlined_call_operand.vmem [shape: f32[32,16], index: 5, kind: input, shape index: {}]   ;;  %s2928_s6 = inlined_call_operand.vmem [shape: f32[1,16], index: 6, kind: input, shape index: {}]   ;;  %s2929_s7 = inlined_call_operand.hbm [shape: f32[16,16], index: 7, kind: output, shape index: {}]  }
   0x1   :  { %13 = vsyncpa [#allocation6], 0 }
   0x2   :  { %14 = vsyncpa [#allocation4], 0 }
   0x3   :  { %16 = vsyncpa [#allocation4 + $0x1], 0  ;;  %s2498_s24 = smov 0   ;;  %s2500_s25 = smov 0  }
   0x4   :  { %s2502_s26 = smov 0   ;;  %s2504_s27 = smov 0  }
   0x5 LB: > { %s2519_s28 = sadd.s32 4294967295, %s2448_s27   ;;  %s1921_s29 = sadd.s32 4294967294, %s2448_s27   ;;  %s2448_s27 = sphi %s2504_s27, %s2943_s27   ;;  %s2444_s26 = sphi %s2502_s26, %s2942_s26   ;;  %s2440_s25 = sphi %s2500_s25, %s2941_s25   ;;  %s2436_s24 = sphi %s2498_s24, %s2940_s24  }
   0x6   : > { %s2523_s30 = sadd.s32 1, %s2448_s27   ;;  %s181_s8 = sadd.s32 1, %s2444_s26 }
   0x7   : > { %s178_s9 = ssub.s32 %s2448_s27, %s2523_s30  ;;  %p191_p0 = scmp.ne.s32.totalorder %s2444_s26, %s2440_s25 }
   0x8   : > { %p179_p1 = scmp.eq.s32.totalorder %s178_s9, 0  ;;  %p192_p2 = scmp.eq.s32.totalorder %s2519_s28, 1 }
   0x9   : > { %p197_p3 = scmp.ne.s32.totalorder %s2440_s25, %s2436_s24  ;;  %p198_p4 = scmp.eq.s32.totalorder %s1921_s29, 1 }
   0xa   : > { %s2534_s10 = scalar_select %p179_p1, %s2444_s26, %s181_s8  }
   0xb   : > { %p2536_p5 = por %p192_p2, %p191_p0  ;;  %p2540_p6 = por %p198_p4, %p197_p3 }
   0xc   : > { %p1922_p7 = scmp.ge.s32.totalorder %s2448_s27, 1  ;;  %p205_p8 = scmp.lt.s32.totalorder %s2448_s27, 3 }
   0xd   : > { %s2932_s12 = scalar_select %p2540_p6, 1, 0 }
   0xe   : > { %p2930_p9 = scmp.eq.s32.totalorder %s2519_s28, 0  ;;  %p2547_p10 = pnand %p1922_p7, %p205_p8 }
   0xf   : > { %s2450_s14 = smov [#allocation5]   ;;  %s2451_s17 = smov [#allocation2]  }
  0x10   : > { %s231_s15 = sshll.u32 %s2450_s14, 4  ;;  %p2242_p11 = pneg %p2547_p10  ;;  %s232_s15 = int_to_ptr.vmem [resolvable:$true] %s231_s15 }
  0x11   : > { %s221_s18 = sshll.u32 %s2451_s17, 4  ;;  %s2452_s19 = smov [#allocation7]   ;;  %s222_s18 = int_to_ptr.vmem [resolvable:$true] %s221_s18 }
  0x12   : > { %p2555_p12 = pnand %p2930_p9, %p2242_p11  ;;  %s245_s20 = sshll.u32 %s2452_s19, 4  ;;  %s246_s20 = int_to_ptr.vmem [resolvable:$true] %s245_s20 }
  0x13   : > { %s2313_s21 = scalar_lea.vmem %s232_s15, 512  ;;  %p2321_p3 = scmp.lt.s32.totalorder %s232_s15, %s232_s15 }
  0x14   : > { %p2304_p13 = pneg %p2555_p12  ;;  %p2314_p0 = scmp.ne.s32.totalorder %s232_s15, %s2313_s21 }
  0x15   : > { %p2322_p4 = scmp.lt.s32.totalorder %s2313_s21, %s2313_s21 }
  0x16   : > { %p2316_p1 = pnand %p2314_p0, %p2304_p13 }
  0x17   : > { %p2323_p7 = por %p2322_p4, %p2321_p3 }
  0x18   : > { %p2317_p2 = pneg %p2316_p1 }
  0x1a   : > { %p2324_p8 = pnand %p2323_p7, %p2317_p2 }
  0x1c   : > { %2327 = shalt.err (!%p2324_p8)
}
  0x1d   : > { %s2453_s22 = smov 128   ;;  %s2454_s23 = smov 8  }
  0x1e   : > { %2248 = dma.hbm_to_vmem [thread:$0]  (!%p2555_p12), %s2925_s3, 512, %s232_s15, [#allocation6], %s2453_s22, %s2453_s22, %s2454_s23  }
  0x1f   : > { %s2339_s9 = scalar_lea.vmem %s222_s18, 16  ;;  %s2346_s14 = scalar_lea.vmem %s222_s18, 32 }
  0x20   : > { %p2340_p11 = scmp.ne.s32.totalorder %s222_s18, %s2339_s9  ;;  %p2347_p9 = scmp.lt.s32.totalorder %s222_s18, %s222_s18 }
  0x21   : > { %p2348_p3 = scmp.lt.s32.totalorder %s2346_s14, %s2339_s9 }
  0x22   : > { %p2342_p0 = pnand %p2340_p11, %p2304_p13 }
  0x23   : > { %p2349_p2 = por %p2348_p3, %p2347_p9 }
  0x24   : > { %p2343_p1 = pneg %p2342_p0 }
  0x26   : > { %p2350_p4 = pnand %p2349_p2, %p2343_p1 }
  0x28   : > { %2353 = shalt.err (!%p2350_p4)
}
  0x29   : > { %2245 = dma.hbm_to_vmem [thread:$0]  (!%p2555_p12), %s2924_s2, 16, %s222_s18, [#allocation3]  }
  0x2a   : > { %s2365_s15 = scalar_lea.vmem %s246_s20, 16  ;;  %s2372_s21 = scalar_lea.vmem %s246_s20, 32 }
  0x2b   : > { %p2366_p7 = scmp.ne.s32.totalorder %s246_s20, %s2365_s15  ;;  %p2373_p0 = scmp.lt.s32.totalorder %s246_s20, %s246_s20 }
  0x2c   : > { %p2374_p6 = scmp.lt.s32.totalorder %s2372_s21, %s2365_s15 }
  0x2d   : > { %p2368_p8 = pnand %p2366_p7, %p2304_p13 }
  0x2e   : > { %p2375_p9 = por %p2374_p6, %p2373_p0 }
  0x2f   : > { %p2369_p11 = pneg %p2368_p8 }
  0x31   : > { %p2376_p1 = pnand %p2375_p9, %p2369_p11 }
  0x33   : > { %2379 = shalt.err (!%p2376_p1)
}
  0x34   : > { %2251 = dma.hbm_to_vmem [thread:$0]  (!%p2555_p12), %s2926_s4, 16, %s246_s20, [#allocation6]  }
  0x35   : > { %271 = sbr.rel (%p2547_p10) target bundleno = 766 (0x2fe), region = 48  ;;  %p2935_p3 = scmp.eq.s32.totalorder (!%p2547_p10), %s2519_s28, 0 }
  0x3a   : > { %2423 = dma.done.wait (%p2935_p3), [#allocation3], 16   ;;  %p2936_p13 = pmov %p2935_p3 }
  0x3b   : > { %p2937_p2 = pmov %p2935_p3 }
  0x3c   : > { %2425 = vsyncadd (%p2936_p13), [#allocation3], 4294967280 }
  0x3d   : > { %2427 = dma.done.wait (%p2937_p2), [#allocation6], 528   ;;  %p2938_p6 = pmov %p2937_p2 }
  0x3e   : > { %p310_p4 = scmp.lt.s32.totalorder %s2519_s28, 1  ;;  %v2455_v0 = vmov 0.0   ;;  %vm2456_vm0 = vmmov 0   ;;  %vm326_vm1 = vcmask 261120   ;;  %v318_v1 = vld [vmem:[%s2923_s1 + $0x18] sm:$0xff]  ;;  %v317_v2 = vld [vmem:[%s2923_s1 + $0x10] sm:$0xff] }
  0x3f   : > { %2429 = vsyncadd (%p2938_p6), [#allocation6], 4294966768  ;;  %2030 = vmatprep.subr.mxu0 %v2455_v0  ;;  %2041 = vmatprep.subr.mxu1 %v2455_v0  ;;  %v316_v3 = vld [vmem:[%s2923_s1 + $0x8] sm:$0xff]  ;;  %v2615_v4 = vand.u32 4294901760, %v318_v1  ;;  %v2617_v5 = vand.u32 4294901760, %v317_v2  ;;  %v315_v7 = vld [vmem:[%s2923_s1] sm:$0xff] }
  0x40   : > { %2038 = vmatprep.mubr.msk.f32.mxu0 %vm2456_vm0, %v2455_v0  ;;  %s311_s13 = scalar_select %p310_p4, %s2519_s28, 1  ;;  %2049 = vmatprep.mubr.msk.f32.mxu1 %vm2456_vm0, %v2455_v0  ;;  %v2619_v6 = vand.u32 4294901760, %v316_v3  ;;  %v2624_v9 = vand.u32 4294901760, %v315_v7  ;;  %v819_v32 = vld [vmem:[#allocation5 + $0x18] sm:$0xff]  ;;  %v818_v34 = vld [vmem:[#allocation5 + $0x10] sm:$0xff]  ;;  %v817_v37 = vld [vmem:[#allocation5 + $0x8] sm:$0xff] }
  0x41   : > { %2031 = vmatpush3.msra.mxu0 %v2615_v4  ;;  %v435_v11 = vsub.f32 %v318_v1, %v2615_v4  ;;  %v442_v13 = vsub.f32 %v317_v2, %v2617_v5  ;;  %v2685_v33 = vand.u32 4294901760, %v819_v32  ;;  %v2690_v36 = vand.u32 4294901760, %v818_v34  ;;  %v816_v41 = vld [vmem:[#allocation5] sm:$0xff]  ;;  %v1933_v59 = vld [vmem:[#allocation2] ss:$0 sm:$0xff]  ;;  %s307_s19 = sand.u32 1, %s2440_s25  }
  0x42   : > { %s1932_s16 = sshll.u32 %s311_s13, 3  ;;  %v449_v14 = vsub.f32 %v316_v3, %v2619_v6  ;;  %2032 = vmatprep.subr.mxu0 %v2455_v0  ;;  %v456_v15 = vsub.f32 %v315_v7, %v2624_v9  ;;  %v2698_v40 = vand.u32 4294901760, %v817_v37  ;;  %v2709_v45 = vand.u32 4294901760, %v816_v41  ;;  %s1931_s15 = sshll.u32 %s307_s19, 3 }
  0x43   : > { %s313_s29 = scalar_lea.vmem %s2922_s0, %s1932_s16  ;;  %2033 = vmatpush3.msra.mxu0 %v2617_v5  ;;  %v436_v16 = vand.u32 4294901760, %v435_v11  ;;  %v443_v18 = vand.u32 4294901760, %v442_v13  ;;  %v2688_v35 = vsub.f32 %v819_v32, %v2685_v33  ;;  %v2696_v39 = vsub.f32 %v818_v34, %v2690_v36  ;;  %s1937_s21 = sshll.u32 %s2519_s28, 7 }
  0x44   : > { %v314_v8 = vld [vmem:[%s313_s29] sm:$0xff]  ;;  %v450_v19 = vand.u32 4294901760, %v449_v14  ;;  %2034 = vmatprep.subr.mxu0 %v2455_v0  ;;  %v457_v20 = vand.u32 4294901760, %v456_v15  ;;  %v2707_v44 = vsub.f32 %v817_v37, %v2698_v40  ;;  %v2718_v49 = vsub.f32 %v816_v41, %v2709_v45  ;;  %s309_s22 = scalar_lea.vmem [#allocation8], %s1931_s15  ;;  %s1829_s18 = scalar_lea.hbm %s2929_s7, %s1937_s21 }
  0x45   : > { %v328_v10 = vsel %vm326_vm1, %v314_v8, 0  ;;  %2035 = vmatpush3.msra.mxu0 %v2619_v6  ;;  %v437_v21 = vsub.f32 %v435_v11, %v436_v16  ;;  %v444_v23 = vsub.f32 %v442_v13, %v443_v18  ;;  %v936_v38 = vand.u32 4294901760, %v2688_v35  ;;  %s1831_s23 = sshll.u32 %s309_s22, 4  ;;  %s1818_s20 = scalar_lea.sflag [#allocation4], %s307_s19  ;;  %s1832_s23 = int_to_ptr.vmem [resolvable:$true] %s1831_s23 }
  0x46   : > { %v2629_v12 = vand.u32 4294901760, %v328_v10  ;;  %v451_v24 = vsub.f32 %v449_v14, %v450_v19  ;;  %2036 = vmatprep.subr.mxu0 %v2455_v0  ;;  %v458_v28 = vsub.f32 %v456_v15, %v457_v20  ;;  %v943_v43 = vand.u32 4294901760, %v2696_v39  ;;  %s2380_s29 = scalar_lea.vmem %s1832_s23, 128  ;;  %s2457_s8 = smov [#allocation8]  }
  0x47   : > { %2037 = vmatpush3.msra.mxu0 %v2624_v9  ;;  %v438_v25 = vand.u32 4294901760, %v437_v21  ;;  %v445_v27 = vand.u32 4294901760, %v444_v23  ;;  %v937_v42 = vsub.f32 %v2688_v35, %v936_v38  ;;  %v950_v48 = vand.u32 4294901760, %v2707_v44  ;;  %v1318_v21 = vld [vmem:[%s2927_s5 + $0x10] sm:$0xff]  ;;  %p2381_p10 = scmp.ne.s32.totalorder %s1832_s23, %s2380_s29  ;;  %s2384_s28 = sshll.u32 %s2457_s8, 4  ;;  %s2385_s28 = int_to_ptr.vmem [resolvable:$false] %s2384_s28 }
  0x48   : > { %v400_v17 = vsub.f32 %v328_v10, %v2629_v12  ;;  %2052 = vmatprep.subr.mxu0 %v2455_v0  ;;  %v452_v30 = vand.u32 4294901760, %v451_v24  ;;  %v459_v31 = vand.u32 4294901760, %v458_v28  ;;  %v944_v47 = vsub.f32 %v2696_v39, %v943_v43  ;;  %v1317_v24 = vld [vmem:[%s2927_s5 + $0x8] sm:$0xff]  ;;  %v1316_v28 = vld [vmem:[%s2927_s5] sm:$0xff]  ;;  %s2386_s9 = scalar_lea.vmem %s2385_s28, 256  ;;  %p2387_p8 = scmp.lt.s32.totalorder %s1832_s23, %s2385_s28 }
  0x49   : > { %2042 = vmatpush3.msra.mxu1 %v438_v25  ;;  %v938_v46 = vand.u32 4294901760, %v937_v42  ;;  %v951_v51 = vsub.f32 %v2707_v44, %v950_v48  ;;  %v957_v52 = vand.u32 4294901760, %v2718_v49  ;;  %v2793_v23 = vand.u32 4294901760, %v1318_v21  ;;  %p2382_p12 = pnand %p2381_p10, %p2536_p5  ;;  %p2388_p11 = scmp.lt.s32.totalorder %s2386_s9, %s2380_s29 }
  0x4a   : > { %v401_v22 = vand.u32 4294901760, %v400_v17  ;;  %2043 = vmatprep.subr.mxu1 %v2455_v0  ;;  %v945_v50 = vand.u32 4294901760, %v944_v47  ;;  %v2818_v32 = vand.u32 4294901760, %v1316_v28  ;;  %vm1815_vm2 = vcmask 130048  }
  0x4b   : > { %2044 = vmatpush3.msra.mxu1 %v445_v27  ;;  %v952_v53 = vand.u32 4294901760, %v951_v51  ;;  %v958_v54 = vsub.f32 %v2718_v49, %v957_v52  ;;  %v2804_v27 = vand.u32 4294901760, %v1317_v24  ;;  %p2383_p7 = pneg %p2382_p12  ;;  %p2389_p0 = por %p2388_p11, %p2387_p8 }
  0x4c   : > { %v402_v26 = vsub.f32 %v400_v17, %v401_v22  ;;  %2045 = vmatprep.subr.mxu1 %v2455_v0 }
  0x4d   : > { %2046 = vmatpush3.msra.mxu1 %v452_v30  ;;  %v959_v55 = vand.u32 4294901760, %v958_v54  ;;  %p2390_p9 = pnand %p2389_p0, %p2383_p7 }
  0x4e   : > { %v403_v29 = vand.u32 4294901760, %v402_v26  ;;  %2047 = vmatprep.subr.mxu1 %v2455_v0  ;;  %v2802_v26 = vsub.f32 %v1318_v21, %v2793_v23 }
  0x4f   : > { %2048 = vmatpush3.msra.mxu1 %v459_v31  ;;  %v2816_v31 = vsub.f32 %v1317_v24, %v2804_v27 }
  0x50   : > { %2039 = vmatmul.mubr.f32.vlgmr.msra.gmra.mxu0 %v403_v29  ;;  %2050 = vmatmul.mubr.f32.vlgmr.msra.gmra.mxu1 %v2629_v12  ;;  %v1443_v30 = vand.u32 4294901760, %v2802_v26 }
  0x51   : > { %2053 = vmatpush3.msra.mxu0 %v435_v11  ;;  %2063 = vmatprep.subr.mxu1 %v2455_v0 }
  0x52   : > { %2054 = vmatprep.subr.mxu0 %v2455_v0  ;;  %2064 = vmatpush3.msra.mxu1 %v2615_v4  ;;  %v1444_v34 = vsub.f32 %v2802_v26, %v1443_v30 }
  0x53   : > { %2055 = vmatpush3.msra.mxu0 %v442_v13  ;;  %2060 = vmatprep.mubr.msk.f32.mxu0 %vm2456_vm0, %v2455_v0 }
  0x54   : > { %2056 = vmatprep.subr.mxu0 %v2455_v0  ;;  %2065 = vmatprep.subr.mxu1 %v2455_v0  ;;  %v1445_v37 = vand.u32 4294901760, %v1444_v34 }
  0x55   : > { %2057 = vmatpush3.msra.mxu0 %v449_v14  ;;  %2066 = vmatpush3.msra.mxu1 %v2617_v5 }
  0x56   : > { %2058 = vmatprep.subr.mxu0 %v2455_v0  ;;  %2067 = vmatprep.subr.mxu1 %v2455_v0 }
  0x57   : > { %2059 = vmatpush3.msra.mxu0 %v456_v15  ;;  %2068 = vmatpush3.msra.mxu1 %v2619_v6 }
  0x58   : > { %2074 = vmatprep.subr.mxu0 %v2455_v0  ;;  %2061 = vmatmul.mubr.f32.vlgmr.msra.gmra.mxu0 %v400_v17 }
  0x59   : > { %2075 = vmatpush3.msra.mxu0 %v436_v16  ;;  %2069 = vmatprep.subr.mxu1 %v2455_v0 }
  0x5a   : > { %2076 = vmatprep.subr.mxu0 %v2455_v0  ;;  %2070 = vmatpush3.msra.mxu1 %v2624_v9 }
  0x5b   : > { %2077 = vmatpush3.msra.mxu0 %v443_v18  ;;  %2071 = vmatprep.mubr.msk.f32.mxu1 %vm2456_vm0, %v2455_v0 }
  0x5c   : > { %2078 = vmatprep.subr.mxu0 %v2455_v0  ;;  %2072 = vmatmul.mubr.f32.vlgmr.msra.gmra.mxu1 %v401_v22 }
  0x5d   : > { %2079 = vmatpush3.msra.mxu0 %v450_v19  ;;  %2085 = vmatprep.subr.mxu1 %v2455_v0  ;;  %v1319_v19 = vld [vmem:[%s2927_s5 + $0x18] sm:$0xff] }
  0x5e   : > { %2080 = vmatprep.subr.mxu0 %v2455_v0  ;;  %2082 = vmatprep.mubr.msk.f32.mxu0 %vm2456_vm0, %v2455_v0 }
  0x5f   : > { %2081 = vmatpush3.msra.mxu0 %v457_v20  ;;  %2086 = vmatpush3.msra.mxu1 %v2615_v4  ;;  %v2785_v20 = vand.u32 4294901760, %v1319_v19 }
  0x60   : > { %2083 = vmatmul.mubr.f32.vlgmr.msra.gmra.mxu0 %v2629_v12  ;;  %2087 = vmatprep.subr.mxu1 %v2455_v0 }
  0x61   : > { %2093 = vmatprep.mubr.msk.f32.mxu1 %vm2456_vm0, %v2455_v0  ;;  %2088 = vmatpush3.msra.mxu1 %v2617_v5  ;;  %v2791_v22 = vsub.f32 %v1319_v19, %v2785_v20 }
  0x62   : > { %2096 = vmatprep.subr.mxu0 %v2455_v0  ;;  %2089 = vmatprep.subr.mxu1 %v2455_v0 }
  0x63   : > { %2104 = vmatprep.mubr.msk.f32.mxu0 %vm2456_vm0, %v2455_v0  ;;  %2090 = vmatpush3.msra.mxu1 %v2619_v6  ;;  %v1436_v25 = vand.u32 4294901760, %v2791_v22 }
  0x64   : > { %2091 = vmatprep.subr.mxu1 %v2455_v0  ;;  %2097 = vmatpush3.msra.mxu0 %v2685_v33 }
  0x65   : > { %2092 = vmatpush3.msra.mxu1 %v2624_v9  ;;  %2098 = vmatprep.subr.mxu0 %v2455_v0  ;;  %v1437_v29 = vsub.f32 %v2791_v22, %v1436_v25 }
  0x66   : > { %2094 = vmatmul.mubr.f32.vlgmr.msra.gmra.mxu1 %v2629_v12  ;;  %2107 = vmatprep.subr.mxu1 %v2455_v0 }
  0x67   : > { %2115 = vmatprep.mubr.msk.f32.mxu1 %vm2456_vm0, %v2455_v0  ;;  %2099 = vmatpush3.msra.mxu0 %v2690_v36 }
  0x68   : > { %2100 = vmatprep.subr.mxu0 %v2455_v0  ;;  %2108 = vmatpush3.msra.mxu1 %v938_v46 }
  0x69   : > { %2101 = vmatpush3.msra.mxu0 %v2698_v40  ;;  %2109 = vmatprep.subr.mxu1 %v2455_v0 }
  0x6a   : > { %2102 = vmatprep.subr.mxu0 %v2455_v0  ;;  %2110 = vmatpush3.msra.mxu1 %v945_v50 }
  0x6b   : > { %2103 = vmatpush3.msra.mxu0 %v2709_v45  ;;  %2111 = vmatprep.subr.mxu1 %v2455_v0 }
  0x6c   : > { %2118 = vmatprep.subr.mxu0 %v2455_v0  ;;  %2112 = vmatpush3.msra.mxu1 %v952_v53 }
  0x6d   : > { %2113 = vmatprep.subr.mxu1 %v2455_v0 }
  0x6e   : > { %2114 = vmatpush3.msra.mxu1 %v959_v55 }
  0x6f   : > { %2129 = vmatprep.subr.mxu1 %v2455_v0 }
 0x110   : > { %v405_v56 = vpop.f32.mrf.mxu0  ;;  %v496_v58 = vpop.f32.mrf.mxu1 }
 0x111   : > { %v406_v62 = vadd.f32 %v1933_v59, %v405_v56 }
 0x112   : > { %v2040_v57 = vpop.f32.mrf.mxu0  ;;  %v2051_v60 = vpop.f32.mrf.mxu1 }
 0x113   : > { %v497_v1 = vadd.f32 %v496_v58, %v406_v62 }
 0x118   : > { %v576_v61 = vpop.f32.mrf.mxu0 }
 0x119   : > { %v577_v4 = vadd.f32 %v576_v61, %v497_v1 }
 0x11a   : > { %v2062_v63 = vpop.f32.mrf.mxu0 }
 0x11c   : > { %v653_v2 = vpop.f32.mrf.mxu1 }
 0x11d   : > { %v654_v6 = vadd.f32 %v653_v2, %v577_v4 }
 0x11e   : > { %v2073_v3 = vpop.f32.mrf.mxu1 }
 0x120   : > { %v736_v5 = vpop.f32.mrf.mxu0 }
 0x121   : > { %v737_v8 = vadd.f32 %v736_v5, %v654_v6 }
 0x122   : > { %v2084_v7 = vpop.f32.mrf.mxu0 }
 0x126   : > { %v811_v9 = vpop.f32.mrf.mxu1 }
 0x127   : > { %v812_v10 = vadd.f32 %v811_v9, %v737_v8 }
 0x128   : > { %v2095_v11 = vpop.f32.mrf.mxu1 }
 0x129   : > { %v815_v12 = vmax.f32 %v812_v10, 0.0 }
 0x12b   : > { %v828_v13 = vsel %vm326_vm1, %v815_v12, 0  ;;  %v1935_v12 = vld [vmem:[%s2928_s6] ss:$0 sm:$0xff] }
 0x12c   : > { %v899_v14 = vand.u32 4294901760, %v828_v13 }
 0x12e   : > { %v900_v15 = vsub.f32 %v828_v13, %v899_v14  ;;  %2116 = vmatmul.mubr.f32.vlgmr.msra.gmra.mxu1 %v899_v14 }
 0x12f   : > { %2130 = vmatpush3.msra.mxu1 %v2685_v33  ;;  %2137 = vmatprep.mubr.msk.f32.mxu1 %vm2456_vm0, %v2455_v0 }
 0x130   : > { %2131 = vmatprep.subr.mxu1 %v2455_v0  ;;  %v901_v16 = vand.u32 4294901760, %v900_v15 }
 0x131   : > { %2132 = vmatpush3.msra.mxu1 %v2690_v36 }
 0x132   : > { %2133 = vmatprep.subr.mxu1 %v2455_v0  ;;  %v902_v17 = vsub.f32 %v900_v15, %v901_v16 }
 0x133   : > { %2134 = vmatpush3.msra.mxu1 %v2698_v40 }
 0x134   : > { %2135 = vmatprep.subr.mxu1 %v2455_v0  ;;  %v903_v18 = vand.u32 4294901760, %v902_v17 }
 0x135   : > { %2136 = vmatpush3.msra.mxu1 %v2709_v45 }
 0x136   : > { %2138 = vmatmul.mubr.f32.vlgmr.msra.gmra.mxu1 %v901_v16  ;;  %2151 = vmatprep.subr.mxu1 %v2455_v0 }
 0x137   : > { %2105 = vmatmul.mubr.f32.vlgmr.msra.gmra.mxu0 %v903_v18  ;;  %2152 = vmatpush3.msra.mxu1 %v2685_v33  ;;  %v1438_v33 = vand.u32 4294901760, %v1437_v29 }
 0x138   : > { %2119 = vmatpush3.msra.mxu0 %v2688_v35  ;;  %2153 = vmatprep.subr.mxu1 %v2455_v0  ;;  %v1450_v35 = vand.u32 4294901760, %v2816_v31 }
 0x139   : > { %2120 = vmatprep.subr.mxu0 %v2455_v0  ;;  %2154 = vmatpush3.msra.mxu1 %v2690_v36  ;;  %v2827_v36 = vsub.f32 %v1316_v28, %v2818_v32 }
 0x13a   : > { %2121 = vmatpush3.msra.mxu0 %v2696_v39  ;;  %2155 = vmatprep.subr.mxu1 %v2455_v0 }
 0x13b   : > { %2122 = vmatprep.subr.mxu0 %v2455_v0  ;;  %2156 = vmatpush3.msra.mxu1 %v2698_v40  ;;  %v1457_v39 = vand.u32 4294901760, %v2827_v36 }
 0x13c   : > { %2123 = vmatpush3.msra.mxu0 %v2707_v44  ;;  %2157 = vmatprep.subr.mxu1 %v2455_v0 }
 0x13d   : > { %2124 = vmatprep.subr.mxu0 %v2455_v0  ;;  %2126 = vmatprep.mubr.msk.f32.mxu0 %vm2456_vm0, %v2455_v0  ;;  %v1458_v41 = vsub.f32 %v2827_v36, %v1457_v39 }
 0x13e   : > { %2125 = vmatpush3.msra.mxu0 %v2718_v49  ;;  %2158 = vmatpush3.msra.mxu1 %v2709_v45  ;;  %v1934_v49 = vld [vmem:[#allocation7] ss:$0 sm:$0xff] }
 0x13f   : > { %2159 = vmatprep.mubr.msk.f32.mxu1 %vm2456_vm0, %v2455_v0  ;;  %2127 = vmatmul.mubr.f32.vlgmr.msra.gmra.mxu0 %v900_v15  ;;  %v1459_v42 = vand.u32 4294901760, %v1458_v41 }
 0x140   : > { %2140 = vmatprep.subr.mxu0 %v2455_v0  ;;  %2160 = vmatmul.mubr.f32.vlgmr.msra.gmra.mxu1 %v899_v14 }
 0x141   : > { %2141 = vmatpush3.msra.mxu0 %v936_v38  ;;  %2148 = vmatprep.mubr.msk.f32.mxu0 %vm2456_vm0, %v2455_v0  ;;  %v1451_v38 = vsub.f32 %v2816_v31, %v1450_v35 }
 0x142   : > { %2142 = vmatprep.subr.mxu0 %v2455_v0  ;;  %2173 = vmatprep.subr.mxu1 %v2455_v0 }
 0x143   : > { %2143 = vmatpush3.msra.mxu0 %v943_v43  ;;  %2181 = vmatprep.mubr.msk.f32.mxu1 %vm2456_vm0, %v2455_v0  ;;  %v1452_v40 = vand.u32 4294901760, %v1451_v38 }
 0x144   : > { %2144 = vmatprep.subr.mxu0 %v2455_v0  ;;  %2174 = vmatpush3.msra.mxu1 %v1438_v33 }
 0x145   : > { %2145 = vmatpush3.msra.mxu0 %v950_v48  ;;  %2175 = vmatprep.subr.mxu1 %v2455_v0 }
 0x146   : > { %2146 = vmatprep.subr.mxu0 %v2455_v0  ;;  %2176 = vmatpush3.msra.mxu1 %v1445_v37 }
 0x147   : > { %2147 = vmatpush3.msra.mxu0 %v957_v52  ;;  %2177 = vmatprep.subr.mxu1 %v2455_v0 }
 0x148   : > { %2149 = vmatmul.mubr.f32.vlgmr.msra.gmra.mxu0 %v899_v14  ;;  %2162 = vmatprep.subr.mxu0 %v2455_v0 }
 0x149   : > { %2170 = vmatprep.mubr.msk.f32.mxu0 %vm2456_vm0, %v2455_v0  ;;  %2163 = vmatpush3.msra.mxu0 %v2785_v20 }
 0x14a   : > { %2164 = vmatprep.subr.mxu0 %v2455_v0  ;;  %2178 = vmatpush3.msra.mxu1 %v1452_v40 }
 0x14b   : > { %2165 = vmatpush3.msra.mxu0 %v2793_v23  ;;  %2179 = vmatprep.subr.mxu1 %v2455_v0 }
 0x14c   : > { %2166 = vmatprep.subr.mxu0 %v2455_v0  ;;  %2180 = vmatpush3.msra.mxu1 %v1459_v42 }
 0x14d   : > { %2167 = vmatpush3.msra.mxu0 %v2804_v27  ;;  %2195 = vmatprep.subr.mxu1 %v2455_v0 }
 0x14e   : > { %2168 = vmatprep.subr.mxu0 %v2455_v0 }
 0x14f   : > { %2169 = vmatpush3.msra.mxu0 %v2818_v32 }
 0x150   : > { %2184 = vmatprep.subr.mxu0 %v2455_v0 }
 0x1ee   : > { %v996_v43 = vpop.f32.mrf.mxu1 }
 0x1f0   : > { %v2117_v44 = vpop.f32.mrf.mxu1 }
 0x1f6   : > { %v1153_v45 = vpop.f32.mrf.mxu1 }
 0x1f7   : > { %v905_v46 = vpop.f32.mrf.mxu0 }
 0x1f8   : > { %v2139_v47 = vpop.f32.mrf.mxu1  ;;  %v906_v50 = vadd.f32 %v1934_v49, %v905_v46 }
 0x1f9   : > { %v2106_v48 = vpop.f32.mrf.mxu0 }
 0x1fa   : > { %v997_v53 = vadd.f32 %v996_v43, %v906_v50 }
 0x1ff   : > { %v1076_v51 = vpop.f32.mrf.mxu0 }
 0x200   : > { %v1311_v52 = vpop.f32.mrf.mxu1  ;;  %v1077_v56 = vadd.f32 %v1076_v51, %v997_v53 }
 0x201   : > { %v2128_v54 = vpop.f32.mrf.mxu0 }
 0x202   : > { %v2161_v55 = vpop.f32.mrf.mxu1  ;;  %v1154_v57 = vadd.f32 %v1153_v45, %v1077_v56 }
 0x208   : > { %v1236_v58 = vpop.f32.mrf.mxu0 }
 0x209   : > { %v1237_v59 = vadd.f32 %v1236_v58, %v1154_v57 }
 0x20a   : > { %v2150_v60 = vpop.f32.mrf.mxu0 }
 0x20b   : > { %v1312_v61 = vadd.f32 %v1311_v52, %v1237_v59 }
 0x20d   : > { %v1315_v62 = vmax.f32 %v1312_v61, 0.0 }
 0x20f   : > { %v1328_v63 = vsel %vm326_vm1, %v1315_v62, 0 }
 0x210   : > { %v1399_v1 = vand.u32 4294901760, %v1328_v63 }
 0x212   : > { %v1400_v2 = vsub.f32 %v1328_v63, %v1399_v1  ;;  %2182 = vmatmul.mubr.f32.vlgmr.msra.gmra.mxu1 %v1399_v1 }
 0x213   : > { %2196 = vmatpush3.msra.mxu1 %v2785_v20  ;;  %2203 = vmatprep.mubr.msk.f32.mxu1 %vm2456_vm0, %v2455_v0 }
 0x214   : > { %2197 = vmatprep.subr.mxu1 %v2455_v0  ;;  %v1401_v3 = vand.u32 4294901760, %v1400_v2 }
 0x215   : > { %2198 = vmatpush3.msra.mxu1 %v2793_v23 }
 0x216   : > { %2199 = vmatprep.subr.mxu1 %v2455_v0  ;;  %v1402_v4 = vsub.f32 %v1400_v2, %v1401_v3 }
 0x217   : > { %2200 = vmatpush3.msra.mxu1 %v2804_v27 }
 0x218   : > { %2201 = vmatprep.subr.mxu1 %v2455_v0  ;;  %v1403_v5 = vand.u32 4294901760, %v1402_v4 }
 0x219   : > { %2202 = vmatpush3.msra.mxu1 %v2818_v32 }
 0x21a   : > { %2204 = vmatmul.mubr.f32.vlgmr.msra.gmra.mxu1 %v1401_v3  ;;  %2217 = vmatprep.subr.mxu1 %v2455_v0 }
 0x21b   : > { %2171 = vmatmul.mubr.f32.vlgmr.msra.gmra.mxu0 %v1403_v5  ;;  %2218 = vmatpush3.msra.mxu1 %v2785_v20 }
 0x21c   : > { %2185 = vmatpush3.msra.mxu0 %v2791_v22  ;;  %2219 = vmatprep.subr.mxu1 %v2455_v0 }
 0x21d   : > { %2186 = vmatprep.subr.mxu0 %v2455_v0  ;;  %2220 = vmatpush3.msra.mxu1 %v2793_v23 }
 0x21e   : > { %2187 = vmatpush3.msra.mxu0 %v2802_v26  ;;  %2221 = vmatprep.subr.mxu1 %v2455_v0 }
 0x21f   : > { %2188 = vmatprep.subr.mxu0 %v2455_v0  ;;  %2222 = vmatpush3.msra.mxu1 %v2804_v27 }
 0x220   : > { %2189 = vmatpush3.msra.mxu0 %v2816_v31  ;;  %2223 = vmatprep.subr.mxu1 %v2455_v0 }
 0x221   : > { %2190 = vmatprep.subr.mxu0 %v2455_v0  ;;  %2192 = vmatprep.mubr.msk.f32.mxu0 %vm2456_vm0, %v2455_v0 }
 0x222   : > { %2191 = vmatpush3.msra.mxu0 %v2827_v36  ;;  %2224 = vmatpush3.msra.mxu1 %v2818_v32 }
 0x223   : > { %2225 = vmatprep.mubr.msk.f32.mxu1 %vm2456_vm0, %v2455_v0  ;;  %2193 = vmatmul.mubr.f32.vlgmr.msra.gmra.mxu0 %v1400_v2 }
 0x224   : > { %2206 = vmatprep.subr.mxu0 %v2455_v0  ;;  %2226 = vmatmul.mubr.f32.vlgmr.msra.gmra.mxu1 %v1399_v1 }
 0x225   : > { %2207 = vmatpush3.msra.mxu0 %v1436_v25  ;;  %2214 = vmatprep.mubr.msk.f32.mxu0 %vm2456_vm0, %v2455_v0 }
 0x226   : > { %2208 = vmatprep.subr.mxu0 %v2455_v0 }
 0x227   : > { %2209 = vmatpush3.msra.mxu0 %v1443_v30 }
 0x228   : > { %2210 = vmatprep.subr.mxu0 %v2455_v0 }
 0x229   : > { %2211 = vmatpush3.msra.mxu0 %v1450_v35 }
 0x22a   : > { %2212 = vmatprep.subr.mxu0 %v2455_v0 }
 0x22b   : > { %2213 = vmatpush3.msra.mxu0 %v1457_v39 }
 0x22c   : > { %2215 = vmatmul.mubr.f32.vlgmr.msra.gmra.mxu0 %v1399_v1 }
 0x2d2   : > { %v1496_v6 = vpop.f32.mrf.mxu1 }
 0x2d4   : > { %v2183_v7 = vpop.f32.mrf.mxu1 }
 0x2da   : > { %v1653_v8 = vpop.f32.mrf.mxu1 }
 0x2db   : > { %v1405_v9 = vpop.f32.mrf.mxu0 }
 0x2dc   : > { %v2205_v10 = vpop.f32.mrf.mxu1  ;;  %v1406_v13 = vadd.f32 %v1935_v12, %v1405_v9 }
 0x2dd   : > { %v2172_v11 = vpop.f32.mrf.mxu0 }
 0x2de   : > { %v1497_v0 = vadd.f32 %v1496_v6, %v1406_v13 }
 0x2e3   : > { %v1576_v14 = vpop.f32.mrf.mxu0 }
 0x2e4   : > { %v1811_v15 = vpop.f32.mrf.mxu1  ;;  %v1577_v18 = vadd.f32 %v1576_v14, %v1497_v0 }
 0x2e5   : > { %v2194_v16 = vpop.f32.mrf.mxu0 }
 0x2e6   : > { %v2227_v17 = vpop.f32.mrf.mxu1  ;;  %v1654_v19 = vadd.f32 %v1653_v8, %v1577_v18 }
 0x2ec   : > { %v1736_v20 = vpop.f32.mrf.mxu0 }
 0x2ed   : > { %v1737_v21 = vadd.f32 %v1736_v20, %v1654_v19 }
 0x2ee   : > { %v2216_v22 = vpop.f32.mrf.mxu0 }
 0x2ef   : > { %v1812_v23 = vadd.f32 %v1811_v15, %v1737_v21 }
 0x2f1   : > { %1816 = vst.msk [vmem:[%s309_s22] sm:$0xff] %vm1815_vm2, %v1812_v23 }
 0x2f2   : > { %2393 = shalt.err (!%p2390_p9)
}
 0x2f3   : > { %s2394_s14 = scalar_lea.hbm %s1829_s18, 128  ;;  %s2398_s15 = scalar_lea.hbm %s2929_s7, 256 }
 0x2f4   : > { %p2395_p1 = scmp.ne.s32.totalorder %s1829_s18, %s2394_s14  ;;  %p2399_p2 = scmp.lt.s32.totalorder %s1829_s18, %s2929_s7 }
 0x2f5   : > { %p2400_p6 = scmp.lt.s32.totalorder %s2398_s15, %s2394_s14 }
 0x2f6   : > { %p2396_p3 = pnand %p2395_p1, %p2536_p5 }
 0x2f7   : > { %p2401_p4 = por %p2400_p6, %p2399_p2 }
 0x2f8   : > { %p2397_p13 = pneg %p2396_p3 }
 0x2fa   : > { %p2402_p10 = pnand %p2401_p4, %p2397_p13 }
 0x2fc   : > { %2405 = shalt.err (!%p2402_p10)
}
 0x2fd   : > { %2240 = dma.vmem_to_hbm [thread:$0]  (%p2536_p5), %s1832_s23, 128, %s1829_s18, %s1818_s20  }
 0x2fe PF: > { %p2262_p12 = scmp.ge.s32.totalorder %s2448_s27, 2  ;;  %s1843_s13 = sand.u32 1, %s2436_s24  }
 0x2ff   : > { %p2939_p7 = scmp.ne.s32.totalorder %s2932_s12, 0  ;;  %s1844_s16 = scalar_lea.sflag [#allocation4], %s1843_s13 }
 0x301   : > { %p2253_p8 = pnand %p2262_p12, %p2939_p7 }
 0x303   : > { %p2254_p11 = pneg %p2253_p8 }
 0x305   : > { %2431 = dma.done.wait (%p2254_p11), %s1844_s16, 128  }
 0x306   : > { %2433 = vsyncadd (%p2254_p11), %s1844_s16, 4294967168  ;;  %p19_p0 = scmp.ge.s32.totalorder %s2523_s30, 4   ;;  %s2940_s24 = smov %s2440_s25 }
 0x307   : > { %s2941_s25 = smov %s2444_s26  ;;  %s2942_s26 = smov %s2534_s10 }
 0x308   : > { %s2943_s27 = smov %s2523_s30  ;;  %21 = sbr.rel (!%p19_p0) target bundleno = 5 (0x5), region = 96 }
 0x30d   :  { %1849 = vsyncpa [#allocation3], 1 }
 0x30e   :  { %1851 = vsyncpa [#allocation3 + $0x1], 1 }
 0x30f   :  { %1852 = vsyncpa [#allocation6], 1 }
 0x310   :  { %1853 = vsyncpa [#allocation4], 1 }
 0x311   :  { %1855 = vsyncpa [#allocation4 + $0x1], 1 }

</bundles_post_ra>
